<compile_context>
chip_gen: v6e
topology: v6e:2x2x1
jax: 0.10.0
libtpu: 0.0.40
codegen_flags: <defaults>
</compile_context>

<pallas_src>
import jax
import jax.numpy as jnp
from jax.experimental import pallas as pl
from jax.experimental.pallas import tpu as pltpu


def _round_up(x, m):
    return ((x + m - 1) // m) * m


def _user_encoder_kernel(news_ref, w_ref, b_ref, q_ref, out_ref):
    # news_ref: (TB, N, D) f32   w_ref: (D, Qp) bf16
    # b_ref:    (1, Qp)  f32     q_ref: (1, Qp) f32     out_ref: (TB, D)
    x3 = news_ref[...]                                    # (TB, N, D)
    tb, n, d = x3.shape

    # One bf16 MXU matmul on the collapsed batch*news slab, f32 accumulation.
    x2 = x3.reshape(tb * n, d).astype(jnp.bfloat16)       # (TB*N, D)
    proj = jnp.tanh(
        jnp.dot(x2, w_ref[...], preferred_element_type=jnp.float32)
        + b_ref[...]                                      # (1, Qp) broadcasts
    )                                                     # (TB*N, Qp) f32

    # Attention scores: VPU multiply + lane reduce (padded Q lanes are zero).
    proj3 = proj.reshape(tb, n, -1)                       # (TB, N, Qp)
    scores = jnp.sum(proj3 * q_ref[...][None, :, :], axis=-1)   # (TB, N)

    # Numerically stable softmax over the browsed-news axis.
    scores = scores - jnp.max(scores, axis=-1, keepdims=True)
    e = jnp.exp(scores)
    alpha = e / jnp.sum(e, axis=-1, keepdims=True)        # (TB, N)

    # Weighted sum of the original f32 news vectors.
    user = jnp.sum(alpha[:, :, None] * x3, axis=1)        # (TB, D)
    out_ref[...] = user.astype(out_ref.dtype)


def user_encoder(news_vectors, weight, bias, query_vector, *, block_b=None):
    """news_vectors: [B, N, D]; weight: [Q, D]; bias: [Q]; query_vector: [Q]."""
    B, N, D = news_vectors.shape
    Q = query_vector.shape[0]
    out_dtype = news_vectors.dtype
    qp = _round_up(Q, 128)                 # lane-dense query dim (minimum 128)

    # Only the tiny operands are padded / re-laid-out in HBM:
    #   weight pre-transposed to (D, Qp) and stored bf16 (MXU input format);
    #   bias / query zero-padded along Q (padded columns contribute exactly 0).
    w_p = jnp.zeros((D, qp), jnp.bfloat16).at[:, :Q].set(weight.T.astype(jnp.bfloat16))
    b_p = jnp.zeros((1, qp), jnp.float32).at[0, :Q].set(bias.astype(jnp.float32))
    q_p = jnp.zeros((1, qp), jnp.float32).at[0, :Q].set(query_vector.astype(jnp.float32))

    # ---- generation-aware batch tile ---------------------------------------
    try:
        vmem_cap = int(pltpu.get_tpu_info().vmem_capacity_bytes)
    except Exception:
        vmem_cap = 64 * 1024 * 1024        # conservative (v7x per-core) fallback
    # Per-batch-row VMEM footprint: double-buffered f32 news tile, in-kernel
    # bf16 copy, f32 proj slab, small temporaries.
    per_row = 2 * N * D * 4 + N * D * 2 + N * qp * 6 + 16 * D + 256
    tb_cap = max(8, (int(0.4 * vmem_cap) // per_row) // 8 * 8)
    if block_b is not None:
        tb_cap = max(1, min(tb_cap, int(block_b)))

    if B <= 8 or (B <= tb_cap and B < 16):
        tb = B                             # single full-batch tile (tb == B is legal)
    else:
        # Keep >= 2 grid steps so the 'parallel' axis can shard across cores
        # (megacore / v7x dual-TC), while staying inside the VMEM budget.
        tb = min(tb_cap, _round_up(pl.cdiv(B, 2), 8))
        tb = max(8, tb // 8 * 8)
    grid = (pl.cdiv(B, tb),)
    # Note: if tb does not divide B the boundary block is handled by Pallas
    # (out-of-bounds output rows are dropped; rows are independent, so any
    # garbage in the padded input rows cannot affect valid rows).

    # Right-sized VMEM limit: actual tile footprint + headroom, never the
    # whole physical VMEM.
    tile_bytes = (
        2 * tb * N * D * 4          # double-buffered news input (f32)
        + 2 * D * qp * 2            # weight (bf16)
        + 4 * qp * 4                # bias + query
        + 2 * tb * D * 4            # double-buffered output block
        + tb * N * D * 2            # in-kernel bf16 copy of the news tile
        + tb * N * qp * 6           # f32 proj slab (+ relayout headroom)
        + tb * N * 16               # scores / alpha temporaries
        + tb * D * 4
    )
    vmem_limit = min(int(tile_bytes * 1.5) + (16 << 20), vmem_cap)

    # Cost estimate reflecting the shapes actually DMA'd (news unpadded,
    # weight padded to Qp in bf16).
    flops = 2 * B * N * D * Q + 2 * B * N * Q + 2 * B * N * D + 5 * B * N
    transcendentals = B * N * Q + B * N                  # tanh + exp
    bytes_accessed = 4 * B * N * D + 2 * D * qp + 8 * qp + 4 * B * D

    out = pl.pallas_call(
        _user_encoder_kernel,
        out_shape=jax.ShapeDtypeStruct((B, D), out_dtype),
        grid=grid,
        in_specs=[
            pl.BlockSpec((tb, N, D), lambda i: (i, 0, 0)),   # last two dims = full extents
            pl.BlockSpec((D, qp), lambda i: (0, 0)),
            pl.BlockSpec((1, qp), lambda i: (0, 0)),
            pl.BlockSpec((1, qp), lambda i: (0, 0)),
        ],
        out_specs=pl.BlockSpec((tb, D), lambda i: (i, 0)),
        compiler_params=pltpu.CompilerParams(
            dimension_semantics=("parallel",),
            vmem_limit_bytes=int(vmem_limit),
        ),
        cost_estimate=pl.CostEstimate(
            flops=int(flops),
            transcendentals=int(transcendentals),
            bytes_accessed=int(bytes_accessed),
        ),
    )(news_vectors, w_p, b_p, q_p)
    return out


def user_encoder_ref(news_vectors, weight, bias, query_vector):
    proj = jnp.tanh(jnp.einsum("bnd,qd->bnq", news_vectors, weight) + bias)
    scores = jnp.einsum("bnq,q->bn", proj, query_vector)
    alpha = jax.nn.softmax(scores, axis=1)
    return jnp.einsum("bn,bnd->bd", alpha, news_vectors)


if __name__ == "__main__":
    # Small config: batch=2, n_browsed_news=8, n_filters=32, query_vector_dim=16
    B, N, D, Q = 2, 8, 32, 16
    key = jax.random.PRNGKey(0)
    k_news, k_w, k_b, k_q = jax.random.split(key, 4)

    news_vectors = jax.random.normal(k_news, (B, N, D), dtype=jnp.float32)
    weight = jax.random.uniform(k_w, (Q, D), jnp.float32, -0.1, 0.1)
    bias = jax.random.uniform(k_b, (Q,), jnp.float32, -0.1, 0.1)
    query_vector = jax.random.uniform(k_q, (Q,), jnp.float32, -0.1, 0.1)

    out = user_encoder(news_vectors, weight, bias, query_vector)
    out = jax.block_until_ready(out)

    ref = user_encoder_ref(news_vectors, weight, bias, query_vector)
    assert out.shape == (B, D)
    # bf16 MXU operands with f32 accumulation -> compare at bf16-level tolerance.
    assert jnp.allclose(out, ref, atol=2e-2, rtol=2e-2), "mismatch vs reference"
    print("KERNEL_OK")
</pallas_src>

<mosaic_0001>
module attributes {stable_mosaic.version = 11 : i64} {
  func.func @_user_encoder_kernel(%arg0: i32, %arg1: memref<2x8x32xf32, #tpu.memory_space<vmem>>, %arg2: memref<32x128xbf16, #tpu.memory_space<vmem>>, %arg3: memref<1x128xf32, #tpu.memory_space<vmem>>, %arg4: memref<1x128xf32, #tpu.memory_space<vmem>>, %arg5: memref<2x32xf32, #tpu.memory_space<vmem>>) attributes {dimension_semantics = [#tpu.dimension_semantics<parallel>], iteration_bounds = array<i64: 1>, scalar_prefetch = 0 : i64, scratch_operands = 0 : i64, tpu.core_type = #tpu.core_type<tc>, window_params = [{transform_indices = @transform_0, window_bounds = array<i64: 2, 8, 32>}, {pipeline_mode = #tpu.pipeline_mode<synchronous>, transform_indices = @transform_1, window_bounds = array<i64: 32, 128>}, {pipeline_mode = #tpu.pipeline_mode<synchronous>, transform_indices = @transform_2, window_bounds = array<i64: 1, 128>}, {pipeline_mode = #tpu.pipeline_mode<synchronous>, transform_indices = @transform_3, window_bounds = array<i64: 1, 128>}, {transform_indices = @transform_4, window_bounds = array<i64: 2, 32>}]} {
    %c0 = arith.constant 0 : index
    %c0_0 = arith.constant 0 : index
    %c0_1 = arith.constant 0 : index
    %0 = vector.load %arg1[%c0, %c0_0, %c0_1] : memref<2x8x32xf32, #tpu.memory_space<vmem>>, vector<2x8x32xf32>
    %1 = vector.shape_cast %0 : vector<2x8x32xf32> to vector<16x32xf32>
    %2 = arith.truncf %1 : vector<16x32xf32> to vector<16x32xbf16>
    %c0_2 = arith.constant 0 : index
    %c0_3 = arith.constant 0 : index
    %3 = vector.load %arg2[%c0_2, %c0_3] : memref<32x128xbf16, #tpu.memory_space<vmem>>, vector<32x128xbf16>
    %cst = arith.constant dense<0.000000e+00> : vector<16x128xf32>
    %4 = tpu.matmul %2, %3, %cst {dimension_numbers = #tpu.dot_dimension_numbers<[1], [0], [0], [1], [0, 0, 1, 1], [], []>} : vector<16x32xbf16>, vector<32x128xbf16>, vector<16x128xf32> -> vector<16x128xf32>
    %c0_4 = arith.constant 0 : index
    %c0_5 = arith.constant 0 : index
    %5 = vector.load %arg3[%c0_4, %c0_5] : memref<1x128xf32, #tpu.memory_space<vmem>>, vector<1x128xf32>
    %6 = vector.broadcast %5 : vector<1x128xf32> to vector<16x128xf32>
    %7 = arith.addf %4, %6 : vector<16x128xf32>
    %8 = math.tanh %7 : vector<16x128xf32>
    %9 = vector.shape_cast %8 : vector<16x128xf32> to vector<2x8x128xf32>
    %c0_6 = arith.constant 0 : index
    %c0_7 = arith.constant 0 : index
    %10 = vector.load %arg4[%c0_6, %c0_7] : memref<1x128xf32, #tpu.memory_space<vmem>>, vector<1x128xf32>
    %11 = vector.shape_cast %10 : vector<1x128xf32> to vector<1x1x128xf32>
    %12 = vector.broadcast %11 : vector<1x1x128xf32> to vector<2x8x128xf32>
    %13 = arith.mulf %9, %12 : vector<2x8x128xf32>
    %cst_8 = arith.constant dense<0.000000e+00> : vector<2x8xf32>
    %14 = vector.multi_reduction <add>, %13, %cst_8 [2] : vector<2x8x128xf32> to vector<2x8xf32>
    %cst_9 = arith.constant dense<0xFF800000> : vector<2xf32>
    %15 = vector.multi_reduction <maximumf>, %14, %cst_9 [1] : vector<2x8xf32> to vector<2xf32>
    %16 = vector.shape_cast %15 : vector<2xf32> to vector<2x1xf32>
    %17 = vector.broadcast %16 : vector<2x1xf32> to vector<2x8xf32>
    %18 = arith.subf %14, %17 : vector<2x8xf32>
    %19 = math.exp %18 : vector<2x8xf32>
    %cst_10 = arith.constant dense<0.000000e+00> : vector<2xf32>
    %20 = vector.multi_reduction <add>, %19, %cst_10 [1] : vector<2x8xf32> to vector<2xf32>
    %21 = vector.shape_cast %20 : vector<2xf32> to vector<2x1xf32>
    %22 = vector.broadcast %21 : vector<2x1xf32> to vector<2x8xf32>
    %23 = arith.divf %19, %22 : vector<2x8xf32>
    %24 = vector.shape_cast %23 : vector<2x8xf32> to vector<2x8x1xf32>
    %25 = vector.broadcast %24 : vector<2x8x1xf32> to vector<2x8x32xf32>
    %26 = arith.mulf %25, %0 : vector<2x8x32xf32>
    %cst_11 = arith.constant dense<0.000000e+00> : vector<2x32xf32>
    %27 = vector.multi_reduction <add>, %26, %cst_11 [1] : vector<2x8x32xf32> to vector<2x32xf32>
    %c0_12 = arith.constant 0 : index
    %c0_13 = arith.constant 0 : index
    %28 = vector.load %arg5[%c0_12, %c0_13] : memref<2x32xf32, #tpu.memory_space<vmem>>, vector<2x32xf32>
    tpu.vector_store %arg5[%c0_12, %c0_13], %27 {strides = array<i32>} : memref<2x32xf32, #tpu.memory_space<vmem>>, vector<2x32xf32>,
    return
  }
  func.func @transform_0(%arg0: i32) -> (i32, i32, i32) {
    %c0_i32 = arith.constant 0 : i32
    %c0_i32_0 = arith.constant 0 : i32
    %c0_i32_1 = arith.constant 0 : i32
    return %arg0, %c0_i32, %c0_i32_0 : i32, i32, i32
  }
  func.func @transform_1(%arg0: i32) -> (i32, i32) {
    %c0_i32 = arith.constant 0 : i32
    %c0_i32_0 = arith.constant 0 : i32
    %c0_i32_1 = arith.constant 0 : i32
    return %c0_i32, %c0_i32_0 : i32, i32
  }
  func.func @transform_2(%arg0: i32) -> (i32, i32) {
    %c0_i32 = arith.constant 0 : i32
    %c0_i32_0 = arith.constant 0 : i32
    %c0_i32_1 = arith.constant 0 : i32
    return %c0_i32, %c0_i32_0 : i32, i32
  }
  func.func @transform_3(%arg0: i32) -> (i32, i32) {
    %c0_i32 = arith.constant 0 : i32
    %c0_i32_0 = arith.constant 0 : i32
    %c0_i32_1 = arith.constant 0 : i32
    return %c0_i32, %c0_i32_0 : i32, i32
  }
  func.func @transform_4(%arg0: i32) -> (i32, i32) {
    %c0_i32 = arith.constant 0 : i32
    %c0_i32_0 = arith.constant 0 : i32
    return %arg0, %c0_i32 : i32, i32
  }
}

</mosaic_0001>

<bundles_post_ra>
// kernel: tpu_custom_call.1
= control target key start
LH: loop header
LB: loop body
LE: loop exit
PB: predicated region body
PF: predicated region fallthrough
CT: control target
= control target key end

     0   :  { %9 = vsyncpa [#allocation3], 0  ;;  %s427_s0 = inlined_call_operand.hbm [shape: f32[2,8,32], index: 0, kind: input, shape index: {}]   ;;  %s428_s1 = inlined_call_operand.hbm [shape: bf16[32,128], index: 1, kind: input, shape index: {}]   ;;  %s429_s2 = inlined_call_operand.vmem [shape: f32[1,128], index: 2, kind: input, shape index: {}]   ;;  %s430_s3 = inlined_call_operand.vmem [shape: f32[1,128], index: 3, kind: input, shape index: {}]   ;;  %s431_s4 = inlined_call_operand.hbm [shape: f32[2,32], index: 4, kind: output, shape index: {}]  }
   0x1   :  { %10 = vsyncpa [#allocation6], 0 }
   0x2   :  { %11 = vsyncpa [#allocation4], 0  ;;  %s361_s15 = smov [#allocation2]  }
   0x3   :  { %s17_s16 = sshll.u32 %s361_s15, 4  ;;  %s18_s16 = int_to_ptr.vmem [resolvable:$true] %s17_s16 }
   0x4   :  { %s303_s17 = scalar_lea.vmem %s18_s16, 256  ;;  %p308_p1 = scmp.lt.s32.totalorder %s18_s16, %s18_s16 }
   0x5   :  { %p304_p0 = scmp.ne.s32.totalorder %s18_s16, %s303_s17  ;;  %p309_p2 = scmp.lt.s32.totalorder %s303_s17, %s303_s17 }
   0x7   :  { %p310_p3 = por %p309_p2, %p308_p1 }
   0x9   :  { %p311_p4 = pnand %p310_p3, %p304_p0 }
   0xb   :  { %314 = shalt.err (!%p311_p4)
}
   0xc   :  { %s362_s18 = smov 128   ;;  %s363_s19 = smov 8  }
   0xd   :  { %23 = dma.hbm_to_vmem [thread:$0]  %s427_s0, 256, %s18_s16, [#allocation3], %s362_s18, %s362_s18, %s363_s19  }
   0xe   :  { %s364_s22 = smov [#allocation5]  }
   0xf   :  { %s29_s23 = sshll.u32 %s364_s22, 4  ;;  %s30_s23 = int_to_ptr.vmem [resolvable:$true] %s29_s23 }
  0x10   :  { %s323_s24 = scalar_lea.vmem %s30_s23, 256  ;;  %p328_p6 = scmp.lt.s32.totalorder %s30_s23, %s30_s23 }
  0x11   :  { %p324_p5 = scmp.ne.s32.totalorder %s30_s23, %s323_s24  ;;  %p329_p7 = scmp.lt.s32.totalorder %s323_s24, %s323_s24 }
  0x13   :  { %p330_p8 = por %p329_p7, %p328_p6 }
  0x15   :  { %p331_p9 = pnand %p330_p8, %p324_p5 }
  0x17   :  { %334 = shalt.err (!%p331_p9)
}
  0x18   :  { %s365_s25 = smov 64   ;;  %s366_s26 = smov 4  }
  0x19   :  { %35 = dma.hbm_to_vmem [thread:$0]  %s428_s1, 256, %s30_s23, [#allocation6], %s365_s25, %s365_s25, %s366_s26  }
  0x1a   :  { %355 = dma.done.wait [#allocation3], 256  }
  0x1b   :  { %356 = vsyncadd [#allocation3], 4294967040 }
  0x1c   :  { %357 = dma.done.wait [#allocation6], 256  }
  0x1d   :  { %358 = vsyncadd [#allocation6], 4294967040  ;;  %v367_v0 = vmov 0.0   ;;  %vm368_vm0 = vmmov 0   ;;  %v281_v1 = vld [vmem:[#allocation5 + $0x8] sm:$0xff]   ;;  %v282_v2 = vld [vmem:[#allocation5] sm:$0xff]   ;;  %v135_v18 = vlaneseq }
  0x1e   :  { %261 = vmatprep.subr.bf16.mxu0 %v367_v0  ;;  %265 = vmatprep.mubr.msk.bf16.mxu0 %vm368_vm0, %v367_v0  ;;  %v402_v3 = vld [vmem:[#allocation2] sm:$0xff]  ;;  %v404_v4 = vld [vmem:[#allocation2 + $0x8] sm:$0xff]  ;;  %vm73_vm1 = vcmask 261120   ;;  %vm145_vm2 = vcmask 1041409   ;;  %vm148_vm3 = vcmask 58368   ;;  %v369_v28 = vmov 0  }
  0x1f   :  { %262 = vmatpush3.bf16.msra.mxu0 %v281_v1  ;;  %v49_v5 = vpack.c.bf16 %v404_v4, %v402_v3  ;;  %v253_v6 = vld [vmem:[%s429_s2] ss:$0 sm:$0xff]  ;;  %v136_v19 = vand.u32 127, %v135_v18  ;;  %v138_v20 = vshrl.u32 %v135_v18, 7  ;;  %280 = vset.pattern.permute.xlu0 %v369_v28  ;;  %s370_s2 = smov [#allocation7]   ;;  %vm235_vm4 = vcmask 254976  }
  0x20   :  { %263 = vmatprep.subr.bf16.mxu0 %v367_v0  ;;  %v257_v13 = vld [vmem:[%s430_s3] ss:$0 sm:$0xff]  ;;  %279 = vset.pattern.permute.xlu1 %v369_v28  ;;  %s243_s3 = sshll.u32 %s370_s2, 4  ;;  %s244_s3 = int_to_ptr.vmem [resolvable:$true] %s243_s3 }
  0x21   :  { %v139_v22 = vsub.s32 %v136_v19, %v138_v20  ;;  %v155_v29 = vsub.s32 0, %v138_v20  ;;  %v159_v30 = vsub.s32 1, %v138_v20  ;;  %s335_s5 = scalar_lea.vmem %s244_s3, 32  ;;  %p340_p11 = scmp.lt.s32.totalorder %s244_s3, %s244_s3 }
  0x22   :  { %p336_p10 = scmp.ne.s32.totalorder %s244_s3, %s335_s5  ;;  %p341_p12 = scmp.lt.s32.totalorder %s335_s5, %s335_s5 }
  0x23   :  { %264 = vmatpush3.bf16.msra.mxu0 %v282_v2 }
  0x24   :  { %p342_p13 = por %p341_p12, %p340_p11 }
  0x26   :  { %266 = vmatmul.mubr.msk.bf16.vlgmr.msra.gmra.mxu0 %vm73_vm1, %v49_v5  ;;  %p343_p0 = pnand %p342_p13, %p336_p10 }
  0xe6   :  { %v111_v7 = vpop.f32.mrf.mxu0 }
  0xe7   :  { %v112_v8 = vadd.f32 %v253_v6, %v111_v7 }
  0xe8   :  { %v267_v9 = vpop.f32.mrf.mxu0 }
  0xe9   :  { %283 = vtanh.f32 %v112_v8 }
  0xea   :  { %v114_v10 = vpop.f32.mrf.mxu0 }
  0xeb   :  { %v115_v11 = vadd.f32 %v253_v6, %v114_v10 }
  0xec   :  { %v268_v12 = vpop.f32.mrf.mxu0 }
  0xed   :  { %285 = vtanh.f32 %v115_v11 }
  0xf6   :  { %v284_v14 = vpop.eup %283 }
  0xf7   :  { %v127_v15 = vmul.f32 %v284_v14, %v257_v13 }
  0xf9   :  { %129 = vadd.xlane.f32.xlu0 %v127_v15 }
  0xfa   :  { %v286_v16 = vpop.eup %285 }
  0xfb   :  { %v128_v17 = vmul.f32 %v286_v16, %v257_v13 }
  0xfd   :  { %131 = vadd.xlane.f32.xlu0 %v128_v17 }
 0x182   :  { %v130_v21 = vpop.xlane.xlu0 %129 }
 0x183   :  { %v140_v24 = vrot.slane %v130_v21, %v139_v22 }
 0x186   :  { %v132_v23 = vpop.xlane.xlu0 %131 }
 0x187   :  { %v144_v25 = vrot.slane %v132_v23, %v139_v22 }
 0x189   :  { %v146_v26 = vsel %vm145_vm2, %v144_v25, %v140_v24 }
 0x18a   :  { %v149_v27 = vsel %vm148_vm3, %v146_v26, -inf }
 0x18b   :  { %150 = vmax.xlane.f32.xlu1 %v149_v27 }
 0x214   :  { %v151_v31 = vpop.xlane.xlu1 %150 }
 0x215   :  { %v156_v32 = vrot.slane %v151_v31, %v155_v29  ;;  %v160_v33 = vrot.slane %v151_v31, %v159_v30 }
 0x217   :  { %v163_v34 = vsub.f32 %v130_v21, %v156_v32  ;;  %v164_v35 = vsub.f32 %v132_v23, %v160_v33 }
 0x219   :  { %v165_v36 = vmul.f32 1.442695, %v163_v34  ;;  %v167_v37 = vmul.f32 1.442695, %v164_v35 }
 0x21b   :  { %287 = vpow2.f32 %v165_v36 }
 0x21c   :  { %289 = vpow2.f32 %v167_v37 }
 0x228   :  { %v288_v38 = vpop.eup %287 }
 0x229   :  { %v290_v39 = vpop.eup %289  ;;  %172 = vperm.xlu1 %279, %v288_v38  }
 0x22a   :  { %175 = vperm.xlu0 %280, %v290_v39  }
 0x2a4   :  { %v173_v40 = vpop.permute.xlu1 %172 }
 0x2a5   :  { %v176_v41 = vpop.permute.xlu0 %175  ;;  %v180_v42 = vrot.slane %v173_v40, %v139_v22 }
 0x2a6   :  { %v184_v43 = vrot.slane %v176_v41, %v139_v22 }
 0x2a8   :  { %v185_v44 = vsel %vm145_vm2, %v184_v43, %v180_v42 }
 0x2a9   :  { %v187_v45 = vsel %vm148_vm3, %v185_v44, 0.0 }
 0x2aa   :  { %188 = vadd.xlane.f32.xlu1 %v187_v45 }
 0x333   :  { %v189_v46 = vpop.xlane.xlu1 %188 }
 0x334   :  { %v194_v47 = vrot.slane %v189_v46, %v155_v29  ;;  %v198_v48 = vrot.slane %v189_v46, %v159_v30 }
 0x336   :  { %291 = vrcp.f32 %v194_v47 }
 0x337   :  { %293 = vrcp.f32 %v198_v48 }
 0x343   :  { %v292_v49 = vpop.eup %291 }
 0x344   :  { %v202_v50 = vmul.f32 %v292_v49, %v288_v38  ;;  %v294_v51 = vpop.eup %293 }
 0x345   :  { %v204_v52 = vmul.f32 %v294_v51, %v290_v39 }
 0x346   :  { %207 = vperm.xlu0 %280, %v202_v50  }
 0x34a   :  { %212 = vperm.xlu0 %280, %v204_v52  }
 0x3c1   :  { %v208_v53 = vpop.permute.xlu0 %207 }
 0x3c2   :  { %v215_v54 = vmul.f32 %v208_v53, %v402_v3 }
 0x3c4   :  { %v217_v55 = vsel %vm73_vm1, %v215_v54, 0.0 }
 0x3c5   :  { %v218_v56 = vrot.slane %v217_v55, 4  ;;  %v213_v57 = vpop.permute.xlu0 %212 }
 0x3c6   :  { %v216_v58 = vmul.f32 %v213_v57, %v404_v4 }
 0x3c7   :  { %v219_v59 = vadd.f32 %v218_v56, %v217_v55 }
 0x3c8   :  { %v224_v60 = vsel %vm73_vm1, %v216_v58, 0.0 }
 0x3c9   :  { %v220_v61 = vrot.slane %v219_v59, 2  ;;  %v225_v62 = vrot.slane %v224_v60, 4 }
 0x3cb   :  { %v221_v63 = vadd.f32 %v220_v61, %v219_v59  ;;  %v226_v0 = vadd.f32 %v225_v62, %v224_v60 }
 0x3cd   :  { %v227_v1 = vrot.slane %v226_v0, 2  ;;  %v222_v2 = vrot.slane %v221_v63, 1 }
 0x3cf   :  { %v228_v5 = vadd.f32 %v227_v1, %v226_v0  ;;  %v223_v3 = vadd.f32 %v222_v2, %v221_v63 }
 0x3d1   :  { %v229_v6 = vrot.slane %v228_v5, 1 }
 0x3d3   :  { %v230_v7 = vadd.f32 %v229_v6, %v228_v5 }
 0x3d5   :  { %v233_v8 = vsel %vm145_vm2, %v230_v7, %v223_v3 }
 0x3d6   :  { %236 = vst.msk [vmem:[#allocation7] sm:$0x3] %vm235_vm4, %v233_v8 }
 0x3d7   :  { %346 = shalt.err (!%p343_p0)
}
 0x3d8   :  { %246 = dma.vmem_to_hbm [thread:$0]  %s244_s3, 32, %s431_s4, [#allocation4]  }
 0x3d9   :  { %359 = dma.done.wait [#allocation4], 32  }
 0x3da   :  { %360 = vsyncadd [#allocation4], 4294967264 }
 0x3db   :  { %250 = vsyncpa [#allocation3], 1 }
 0x3dc   :  { %251 = vsyncpa [#allocation6], 1 }
 0x3dd   :  { %252 = vsyncpa [#allocation4], 1 }

</bundles_post_ra>
